<compile_context>
chip_gen: v7x
topology: tpu7x:2x2x1
jax: 0.10.0
libtpu: 0.0.40
codegen_flags: <defaults>
</compile_context>

<pallas_src>
import jax
import jax.numpy as jnp
from jax.experimental import pallas as pl
from jax.experimental.pallas import tpu as pltpu

# Small hyperparameters consistent with the module's constructor.
OUTPUT_DIM = 32                       # vocab size
EMB_DIM    = 16
HID_DIM    = 32                       # attn_combine requires emb_dim + enc_dim == hid_dim
ENC_DIM    = HID_DIM - EMB_DIM        # encoder feature dim implied by the forward pass
N_LAYERS   = 2
MAX_LENGTH = 8                        # attention window / encoder length (small test size)
BATCH      = 2


def _round8(n):
    return (n + 7) // 8 * 8


def _round_up(n, m):
    return (n + m - 1) // m * m


# ----------------------------------------------------------------------------------
# Single packed weight slab: each block starts at a sublane-tile (multiple-of-8 row)
# boundary and is padded to the 128-lane slab width.
# ----------------------------------------------------------------------------------
_SLAB_BLOCKS = [
    ("emb",    (OUTPUT_DIM, EMB_DIM)),                 # embedding table (V, E)
    ("w_ec",   (EMB_DIM, MAX_LENGTH + EMB_DIM)),       # [w_attn_e | w_comb_e]  (E, T+E)
    ("b_ac",   (1, MAX_LENGTH + EMB_DIM)),             # [b_attn   | b_comb  ]  (1, T+E)
    ("w_ah",   (HID_DIM, MAX_LENGTH)),                 # attn weight, hidden half (H, T)
    ("w_ca",   (ENC_DIM, EMB_DIM)),                    # attn_combine, attn-applied half (C, E)
    ("w_ih0",  (EMB_DIM, 4 * HID_DIM)),                # LSTM layer 0 input weight^T
    ("w_hh0",  (HID_DIM, 4 * HID_DIM)),                # LSTM layer 0 recurrent weight^T
    ("w_ih1",  (HID_DIM, 4 * HID_DIM)),                # LSTM layer 1 input weight^T
    ("w_hh1",  (HID_DIM, 4 * HID_DIM)),                # LSTM layer 1 recurrent weight^T
    ("b_lstm", (N_LAYERS, 4 * HID_DIM)),               # b_ih + b_hh per layer
    ("w_out",  (HID_DIM, OUTPUT_DIM)),                 # output projection^T
    ("b_out",  (1, OUTPUT_DIM)),
]
_SLAB_SHAPES = dict(_SLAB_BLOCKS)
_SLAB_OFFSETS = {}
_r = 0
for _name, _shape in _SLAB_BLOCKS:
    _SLAB_OFFSETS[_name] = _r
    _r += _round8(_shape[0])
SLAB_ROWS = _r                         # 264
SLAB_WIDTH = 128

# Merged lane-dense output slab: [pred | h(L*H) | c(L*H) | attn | pad] per batch row.
_OUT_USED = OUTPUT_DIM + 2 * N_LAYERS * HID_DIM + MAX_LENGTH          # 168
OUT_W = _round_up(_OUT_USED, 128)                                     # 256


def decoder_attn_kernel(
    tokens_ref,      # SMEM (B,)                int32
    slab_ref,        # VMEM (SLAB_ROWS, 128)    packed weights
    h_ref,           # VMEM (B, L*H)            hidden, batch-first, layer-major
    c_ref,           # VMEM (B, L*H)            cell
    enc_ref,         # VMEM (B, T, C)           encoder outputs, batch-first
    out_ref,         # VMEM (B, OUT_W)          merged output slab
):
    E, H, V, T, L = EMB_DIM, HID_DIM, OUTPUT_DIM, MAX_LENGTH, N_LAYERS
    B = h_ref.shape[0]
    C = enc_ref.shape[2]

    def blk(name):
        r0 = _SLAB_OFFSETS[name]
        rows, cols = _SLAB_SHAPES[name]
        return slab_ref[pl.ds(r0, rows), pl.ds(0, cols)]

    # ---- embedding lookup as a one-hot MXU dot (no dynamic slices; dropout = id) ----
    row_id = jax.lax.broadcasted_iota(jnp.int32, (B, V), 0)
    lane_id = jax.lax.broadcasted_iota(jnp.int32, (B, V), 1)
    onehot = jnp.zeros((B, V), jnp.float32)
    for b in range(B):
        tok = tokens_ref[b]
        onehot = jnp.where(jnp.logical_and(row_id == b, lane_id == tok), 1.0, onehot)
    emb = jnp.dot(onehot, blk("emb"), preferred_element_type=jnp.float32)      # (B, E)

    # ---- shared-LHS fused dot: emb @ [w_attn_e | w_comb_e] + [b_attn | b_comb] ------
    ec = jnp.dot(emb, blk("w_ec"), preferred_element_type=jnp.float32) + blk("b_ac")  # (B, T+E)

    # ---- attn_weights = softmax(W_e emb + W_h h0 + b) --------------------------------
    h_top = h_ref[:, pl.ds(0, H)]                                              # (B, H)
    logits = ec[:, :T] + jnp.dot(h_top, blk("w_ah"),
                                 preferred_element_type=jnp.float32)           # (B, T)
    logits = logits - jnp.max(logits, axis=1, keepdims=True)
    p = jnp.exp(logits)
    attn_w = p / jnp.sum(p, axis=1, keepdims=True)                             # exact softmax

    # ---- attn_applied[b] = attn_w[b] @ enc[b]  (tiny per-row 2D MXU dots) ------------
    applied_rows = []
    for b in range(B):
        applied_rows.append(
            jnp.dot(attn_w[b:b + 1, :], enc_ref[b],
                    preferred_element_type=jnp.float32))                       # (1, C)
    applied = jnp.concatenate(applied_rows, axis=0)                            # (B, C)

    # ---- attn_combine + relu (emb partial already in ec) ----------------------------
    comb = ec[:, T:T + E] + jnp.dot(applied, blk("w_ca"),
                                    preferred_element_type=jnp.float32)        # (B, E)
    x = jnp.maximum(comb, 0.0)

    # ---- 2-layer single-step LSTM: split accumulating dots, no lane concat ----------
    col = jax.lax.broadcasted_iota(jnp.int32, (B, 4 * H), 1)
    is_g = jnp.logical_and(col >= 2 * H, col < 3 * H)                          # tanh lanes
    b_lstm = blk("b_lstm")                                                     # (L, 4H)
    w_ih = (blk("w_ih0"), blk("w_ih1"))
    w_hh = (blk("w_hh0"), blk("w_hh1"))

    new_h, new_c = [], []
    for layer in range(L):
        h_prev = h_ref[:, pl.ds(layer * H, H)]                                 # (B, H)
        c_prev = c_ref[:, pl.ds(layer * H, H)]                                 # (B, H)
        gates = (jnp.dot(x, w_ih[layer], preferred_element_type=jnp.float32)
                 + jnp.dot(h_prev, w_hh[layer], preferred_element_type=jnp.float32)
                 + b_lstm[layer:layer + 1, :])                                 # (B, 4H)
        # Full-width activations: two EUP passes + one lane select.
        sig = jax.nn.sigmoid(gates)
        tnh = jnp.tanh(gates)
        act = jnp.where(is_g, tnh, sig)                                        # [σi, σf, tanh g, σo]
        i_a = act[:, 0 * H:1 * H]
        f_a = act[:, 1 * H:2 * H]
        g_a = act[:, 2 * H:3 * H]
        o_a = act[:, 3 * H:4 * H]
        c_new = f_a * c_prev + i_a * g_a
        h_new = o_a * jnp.tanh(c_new)
        new_h.append(h_new)
        new_c.append(c_new)
        x = h_new

    # ---- output projection ------------------------------------------------------------
    pred = jnp.dot(x, blk("w_out"), preferred_element_type=jnp.float32) + blk("b_out")  # (B, V)

    # ---- single lane-dense merged store: [pred | h0 | h1 | c0 | c1 | attn | pad] -------
    pieces = [pred] + new_h + new_c + [attn_w]
    pad_w = OUT_W - _OUT_USED
    if pad_w > 0:
        pieces.append(jnp.zeros((B, pad_w), jnp.float32))
    out_ref[...] = jnp.concatenate(pieces, axis=1)                             # (B, OUT_W)


@jax.jit
def decoder_attn_step(tokens, hidden_bf, cell_bf, encoder_outputs_bf, weight_slab):
    """One decode step. State is batch-first and stays batch-first across steps.

    tokens               (B,)        int32
    hidden_bf / cell_bf  (B, L, H)   float32
    encoder_outputs_bf   (B, T, C)   float32
    weight_slab          (SLAB_ROWS, 128) float32 from init_params()
    returns: prediction (B,V), new hidden (B,L,H), new cell (B,L,H), attn_weights (B,T)
    """
    B = tokens.shape[0]
    L, H, V, T = N_LAYERS, HID_DIM, OUTPUT_DIM, MAX_LENGTH

    # Free row-major bitcast reshapes (no transposes): layer-major flat state.
    h_flat = hidden_bf.reshape(B, L * H)
    c_flat = cell_bf.reshape(B, L * H)

    out = pl.pallas_call(
        decoder_attn_kernel,
        out_shape=jax.ShapeDtypeStruct((B, OUT_W), jnp.float32),
        in_specs=[
            pl.BlockSpec(memory_space=pltpu.MemorySpace.SMEM),   # tokens (scalar reads)
            pl.BlockSpec(memory_space=pltpu.MemorySpace.VMEM),   # packed weight slab
            pl.BlockSpec(memory_space=pltpu.MemorySpace.VMEM),   # hidden (B, L*H)
            pl.BlockSpec(memory_space=pltpu.MemorySpace.VMEM),   # cell   (B, L*H)
            pl.BlockSpec(memory_space=pltpu.MemorySpace.VMEM),   # encoder outputs
        ],
        out_specs=pl.BlockSpec(memory_space=pltpu.MemorySpace.VMEM),
    )(tokens, weight_slab, h_flat, c_flat, encoder_outputs_bf)

    pred   = out[:, 0:V]
    h_new  = out[:, V:V + L * H].reshape(B, L, H)
    c_new  = out[:, V + L * H:V + 2 * L * H].reshape(B, L, H)
    attn_w = out[:, V + 2 * L * H:V + 2 * L * H + T]
    return pred, h_new, c_new, attn_w


def init_params(key):
    """Random parameters, packed into a single (SLAB_ROWS, 128) VMEM-ready slab."""
    E, H, V, T, L, C = EMB_DIM, HID_DIM, OUTPUT_DIM, MAX_LENGTH, N_LAYERS, ENC_DIM
    ks = jax.random.split(key, 15)

    def u(k, shape, fan_in):
        bound = 1.0 / (fan_in ** 0.5)
        return jax.random.uniform(k, shape, jnp.float32, -bound, bound)

    emb_tbl = jax.random.normal(ks[0], (V, E), jnp.float32)

    # attn: Linear(E + H -> T); pre-split into embedded / hidden halves (stored (in,out)).
    w_attn_e = u(ks[1], (E, T), E + H)
    w_attn_h = u(ks[2], (H, T), E + H)
    b_attn   = u(ks[3], (1, T), E + H)

    # attn_combine: Linear(H = E + C -> E); pre-split into embedded / attn-applied halves.
    w_comb_e = u(ks[4], (E, E), H)
    w_comb_a = u(ks[5], (C, E), H)
    b_comb   = u(ks[6], (1, E), H)

    # LSTM (PyTorch gate order i, f, g, o), stored transposed; bias = b_ih + b_hh.
    w_ih0 = u(ks[7], (E, 4 * H), H)
    w_hh0 = u(ks[8], (H, 4 * H), H)
    w_ih1 = u(ks[9], (H, 4 * H), H)
    w_hh1 = u(ks[10], (H, 4 * H), H)
    b_l0  = u(ks[11], (1, 4 * H), H)
    b_l1  = u(ks[12], (1, 4 * H), H)

    w_out = u(ks[13], (H, V), H)
    b_out = u(ks[14], (1, V), H)

    blocks = {
        "emb":    emb_tbl,
        "w_ec":   jnp.concatenate([w_attn_e, w_comb_e], axis=1),   # (E, T + E)
        "b_ac":   jnp.concatenate([b_attn, b_comb], axis=1),       # (1, T + E)
        "w_ah":   w_attn_h,
        "w_ca":   w_comb_a,
        "w_ih0":  w_ih0, "w_hh0": w_hh0, "w_ih1": w_ih1, "w_hh1": w_hh1,
        "b_lstm": jnp.concatenate([b_l0, b_l1], axis=0),            # (L, 4H)
        "w_out":  w_out,
        "b_out":  b_out,
    }

    slab = jnp.zeros((SLAB_ROWS, SLAB_WIDTH), jnp.float32)
    for name, shape in _SLAB_BLOCKS:
        r0 = _SLAB_OFFSETS[name]
        rows, cols = shape
        slab = slab.at[r0:r0 + rows, 0:cols].set(blocks[name])
    return slab


if __name__ == "__main__":
    key = jax.random.PRNGKey(0)
    kp, kt, kh, kc, ke = jax.random.split(key, 5)

    weight_slab = init_params(kp)
    tokens = jax.random.randint(kt, (BATCH,), 0, OUTPUT_DIM, dtype=jnp.int32)
    # Recurrent state and encoder outputs are kept batch-first across decode steps
    # (PyTorch's (L,B,H)/(T,B,C) layouts would be transposed ONCE at the boundary,
    # not every step).
    hidden = jax.random.normal(kh, (BATCH, N_LAYERS, HID_DIM), jnp.float32)
    cell   = jax.random.normal(kc, (BATCH, N_LAYERS, HID_DIM), jnp.float32)
    encoder_outputs = jax.random.normal(ke, (BATCH, MAX_LENGTH, ENC_DIM), jnp.float32)

    pred, h_out, c_out, attn_w = decoder_attn_step(
        tokens, hidden, cell, encoder_outputs, weight_slab)
    jax.block_until_ready((pred, h_out, c_out, attn_w))

    assert pred.shape == (BATCH, OUTPUT_DIM)
    assert h_out.shape == (BATCH, N_LAYERS, HID_DIM)
    assert c_out.shape == (BATCH, N_LAYERS, HID_DIM)
    assert attn_w.shape == (BATCH, MAX_LENGTH)
    assert bool(jnp.all(jnp.isfinite(pred)))
    assert bool(jnp.allclose(jnp.sum(attn_w, axis=1), 1.0, atol=1e-5))
    print("KERNEL_OK")
</pallas_src>

<mosaic_0001>
module attributes {stable_mosaic.version = 11 : i64} {
  func.func @decoder_attn_kernel(%arg0: memref<2xi32, #tpu.memory_space<smem>>, %arg1: memref<264x128xf32, #tpu.memory_space<vmem>>, %arg2: memref<2x64xf32, #tpu.memory_space<vmem>>, %arg3: memref<2x64xf32, #tpu.memory_space<vmem>>, %arg4: memref<2x8x16xf32, #tpu.memory_space<vmem>>, %arg5: memref<2x256xf32, #tpu.memory_space<vmem>>) attributes {dimension_semantics = [], scalar_prefetch = 0 : i64, scratch_operands = 0 : i64, tpu.core_type = #tpu.core_type<tc>} {
    %0 = tpu.iota {dimensions = array<i32: 0>} : vector<2x32xi32>
    %1 = tpu.iota {dimensions = array<i32: 1>} : vector<2x32xi32>
    %cst = arith.constant 0.000000e+00 : f32
    %2 = vector.broadcast %cst : f32 to vector<2x32xf32>
    %c0 = arith.constant 0 : index
    %3 = memref.load %arg0[%c0] : memref<2xi32, #tpu.memory_space<smem>>
    %c0_i32 = arith.constant 0 : i32
    %4 = vector.broadcast %c0_i32 : i32 to vector<2x32xi32>
    %5 = arith.cmpi eq, %0, %4 : vector<2x32xi32>
    %6 = vector.broadcast %3 : i32 to vector<2x32xi32>
    %7 = arith.cmpi eq, %1, %6 : vector<2x32xi32>
    %8 = arith.andi %5, %7 : vector<2x32xi1>
    %cst_0 = arith.constant 1.000000e+00 : f32
    %9 = vector.broadcast %cst_0 : f32 to vector<2x32xf32>
    %10 = arith.select %8, %9, %2 : vector<2x32xi1>, vector<2x32xf32>
    %c1 = arith.constant 1 : index
    %11 = memref.load %arg0[%c1] : memref<2xi32, #tpu.memory_space<smem>>
    %c1_i32 = arith.constant 1 : i32
    %12 = vector.broadcast %c1_i32 : i32 to vector<2x32xi32>
    %13 = arith.cmpi eq, %0, %12 : vector<2x32xi32>
    %14 = vector.broadcast %11 : i32 to vector<2x32xi32>
    %15 = arith.cmpi eq, %1, %14 : vector<2x32xi32>
    %16 = arith.andi %13, %15 : vector<2x32xi1>
    %cst_1 = arith.constant 1.000000e+00 : f32
    %17 = vector.broadcast %cst_1 : f32 to vector<2x32xf32>
    %18 = arith.select %16, %17, %10 : vector<2x32xi1>, vector<2x32xf32>
    %c0_2 = arith.constant 0 : index
    %c0_3 = arith.constant 0 : index
    %19 = vector.load %arg1[%c0_2, %c0_3] : memref<264x128xf32, #tpu.memory_space<vmem>>, vector<32x16xf32>
    %cst_4 = arith.constant dense<0.000000e+00> : vector<2x16xf32>
    %20 = tpu.matmul %18, %19, %cst_4 {dimension_numbers = #tpu.dot_dimension_numbers<[1], [0], [0], [1], [0, 0, 1, 1], [], []>} : vector<2x32xf32>, vector<32x16xf32>, vector<2x16xf32> -> vector<2x16xf32>
    %c32 = arith.constant 32 : index
    %c0_5 = arith.constant 0 : index
    %21 = vector.load %arg1[%c32, %c0_5] : memref<264x128xf32, #tpu.memory_space<vmem>>, vector<16x24xf32>
    %cst_6 = arith.constant dense<0.000000e+00> : vector<2x24xf32>
    %22 = tpu.matmul %20, %21, %cst_6 {dimension_numbers = #tpu.dot_dimension_numbers<[1], [0], [0], [1], [0, 0, 1, 1], [], []>} : vector<2x16xf32>, vector<16x24xf32>, vector<2x24xf32> -> vector<2x24xf32>
    %c48 = arith.constant 48 : index
    %c0_7 = arith.constant 0 : index
    %23 = vector.load %arg1[%c48, %c0_7] : memref<264x128xf32, #tpu.memory_space<vmem>>, vector<1x24xf32>
    %24 = vector.broadcast %23 : vector<1x24xf32> to vector<2x24xf32>
    %25 = arith.addf %22, %24 : vector<2x24xf32>
    %c0_8 = arith.constant 0 : index
    %c0_9 = arith.constant 0 : index
    %26 = vector.load %arg2[%c0_8, %c0_9] : memref<2x64xf32, #tpu.memory_space<vmem>>, vector<2x32xf32>
    %27 = vector.extract_strided_slice %25 {offsets = [0, 0], sizes = [2, 8], strides = [1, 1]} : vector<2x24xf32> to vector<2x8xf32>
    %c56 = arith.constant 56 : index
    %c0_10 = arith.constant 0 : index
    %28 = vector.load %arg1[%c56, %c0_10] : memref<264x128xf32, #tpu.memory_space<vmem>>, vector<32x8xf32>
    %cst_11 = arith.constant dense<0.000000e+00> : vector<2x8xf32>
    %29 = tpu.matmul %26, %28, %cst_11 {dimension_numbers = #tpu.dot_dimension_numbers<[1], [0], [0], [1], [0, 0, 1, 1], [], []>} : vector<2x32xf32>, vector<32x8xf32>, vector<2x8xf32> -> vector<2x8xf32>
    %30 = arith.addf %27, %29 : vector<2x8xf32>
    %cst_12 = arith.constant dense<0xFF800000> : vector<2xf32>
    %31 = vector.multi_reduction <maximumf>, %30, %cst_12 [1] : vector<2x8xf32> to vector<2xf32>
    %32 = vector.shape_cast %31 : vector<2xf32> to vector<2x1xf32>
    %33 = vector.broadcast %32 : vector<2x1xf32> to vector<2x8xf32>
    %34 = arith.subf %30, %33 : vector<2x8xf32>
    %35 = math.exp %34 : vector<2x8xf32>
    %cst_13 = arith.constant dense<0.000000e+00> : vector<2xf32>
    %36 = vector.multi_reduction <add>, %35, %cst_13 [1] : vector<2x8xf32> to vector<2xf32>
    %37 = vector.shape_cast %36 : vector<2xf32> to vector<2x1xf32>
    %38 = vector.broadcast %37 : vector<2x1xf32> to vector<2x8xf32>
    %39 = arith.divf %35, %38 : vector<2x8xf32>
    %40 = vector.extract_strided_slice %39 {offsets = [0, 0], sizes = [1, 8], strides = [1, 1]} : vector<2x8xf32> to vector<1x8xf32>
    %c0_14 = arith.constant 0 : index
    %c0_15 = arith.constant 0 : index
    %c0_16 = arith.constant 0 : index
    %41 = vector.load %arg4[%c0_14, %c0_15, %c0_16] : memref<2x8x16xf32, #tpu.memory_space<vmem>>, vector<1x8x16xf32>
    %42 = vector.shape_cast %41 : vector<1x8x16xf32> to vector<8x16xf32>
    %cst_17 = arith.constant dense<0.000000e+00> : vector<1x16xf32>
    %43 = tpu.matmul %40, %42, %cst_17 {dimension_numbers = #tpu.dot_dimension_numbers<[1], [0], [0], [1], [0, 0, 1, 1], [], []>} : vector<1x8xf32>, vector<8x16xf32>, vector<1x16xf32> -> vector<1x16xf32>
    %44 = vector.extract_strided_slice %39 {offsets = [1, 0], sizes = [1, 8], strides = [1, 1]} : vector<2x8xf32> to vector<1x8xf32>
    %c1_18 = arith.constant 1 : index
    %c0_19 = arith.constant 0 : index
    %c0_20 = arith.constant 0 : index
    %45 = vector.load %arg4[%c1_18, %c0_19, %c0_20] : memref<2x8x16xf32, #tpu.memory_space<vmem>>, vector<1x8x16xf32>
    %46 = vector.shape_cast %45 : vector<1x8x16xf32> to vector<8x16xf32>
    %cst_21 = arith.constant dense<0.000000e+00> : vector<1x16xf32>
    %47 = tpu.matmul %44, %46, %cst_21 {dimension_numbers = #tpu.dot_dimension_numbers<[1], [0], [0], [1], [0, 0, 1, 1], [], []>} : vector<1x8xf32>, vector<8x16xf32>, vector<1x16xf32> -> vector<1x16xf32>
    %48 = tpu.concatenate %43, %47 in 0 : vector<1x16xf32>, vector<1x16xf32> -> vector<2x16xf32>
    %49 = vector.extract_strided_slice %25 {offsets = [0, 8], sizes = [2, 16], strides = [1, 1]} : vector<2x24xf32> to vector<2x16xf32>
    %c88 = arith.constant 88 : index
    %c0_22 = arith.constant 0 : index
    %50 = vector.load %arg1[%c88, %c0_22] : memref<264x128xf32, #tpu.memory_space<vmem>>, vector<16x16xf32>
    %cst_23 = arith.constant dense<0.000000e+00> : vector<2x16xf32>
    %51 = tpu.matmul %48, %50, %cst_23 {dimension_numbers = #tpu.dot_dimension_numbers<[1], [0], [0], [1], [0, 0, 1, 1], [], []>} : vector<2x16xf32>, vector<16x16xf32>, vector<2x16xf32> -> vector<2x16xf32>
    %52 = arith.addf %49, %51 : vector<2x16xf32>
    %cst_24 = arith.constant 0.000000e+00 : f32
    %53 = vector.broadcast %cst_24 : f32 to vector<2x16xf32>
    %54 = arith.maximumf %52, %53 : vector<2x16xf32>
    %55 = tpu.iota {dimensions = array<i32: 1>} : vector<2x128xi32>
    %c64_i32 = arith.constant 64 : i32
    %56 = vector.broadcast %c64_i32 : i32 to vector<2x128xi32>
    %57 = arith.cmpi sge, %55, %56 : vector<2x128xi32>
    %c96_i32 = arith.constant 96 : i32
    %58 = vector.broadcast %c96_i32 : i32 to vector<2x128xi32>
    %59 = arith.cmpi slt, %55, %58 : vector<2x128xi32>
    %60 = arith.andi %57, %59 : vector<2x128xi1>
    %c216 = arith.constant 216 : index
    %c0_25 = arith.constant 0 : index
    %61 = vector.load %arg1[%c216, %c0_25] : memref<264x128xf32, #tpu.memory_space<vmem>>, vector<2x128xf32>
    %c104 = arith.constant 104 : index
    %c0_26 = arith.constant 0 : index
    %62 = vector.load %arg1[%c104, %c0_26] : memref<264x128xf32, #tpu.memory_space<vmem>>, vector<16x128xf32>
    %c152 = arith.constant 152 : index
    %c0_27 = arith.constant 0 : index
    %63 = vector.load %arg1[%c152, %c0_27] : memref<264x128xf32, #tpu.memory_space<vmem>>, vector<32x128xf32>
    %c120 = arith.constant 120 : index
    %c0_28 = arith.constant 0 : index
    %64 = vector.load %arg1[%c120, %c0_28] : memref<264x128xf32, #tpu.memory_space<vmem>>, vector<32x128xf32>
    %c184 = arith.constant 184 : index
    %c0_29 = arith.constant 0 : index
    %65 = vector.load %arg1[%c184, %c0_29] : memref<264x128xf32, #tpu.memory_space<vmem>>, vector<32x128xf32>
    %c0_30 = arith.constant 0 : index
    %c0_31 = arith.constant 0 : index
    %66 = vector.load %arg2[%c0_30, %c0_31] : memref<2x64xf32, #tpu.memory_space<vmem>>, vector<2x32xf32>
    %c0_32 = arith.constant 0 : index
    %c0_33 = arith.constant 0 : index
    %67 = vector.load %arg3[%c0_32, %c0_33] : memref<2x64xf32, #tpu.memory_space<vmem>>, vector<2x32xf32>
    %cst_34 = arith.constant dense<0.000000e+00> : vector<2x128xf32>
    %68 = tpu.matmul %54, %62, %cst_34 {dimension_numbers = #tpu.dot_dimension_numbers<[1], [0], [0], [1], [0, 0, 1, 1], [], []>} : vector<2x16xf32>, vector<16x128xf32>, vector<2x128xf32> -> vector<2x128xf32>
    %cst_35 = arith.constant dense<0.000000e+00> : vector<2x128xf32>
    %69 = tpu.matmul %66, %64, %cst_35 {dimension_numbers = #tpu.dot_dimension_numbers<[1], [0], [0], [1], [0, 0, 1, 1], [], []>} : vector<2x32xf32>, vector<32x128xf32>, vector<2x128xf32> -> vector<2x128xf32>
    %70 = arith.addf %68, %69 : vector<2x128xf32>
    %71 = vector.extract_strided_slice %61 {offsets = [0, 0], sizes = [1, 128], strides = [1, 1]} : vector<2x128xf32> to vector<1x128xf32>
    %72 = vector.broadcast %71 : vector<1x128xf32> to vector<2x128xf32>
    %73 = arith.addf %70, %72 : vector<2x128xf32>
    %74 = arith.negf %73 : vector<2x128xf32>
    %75 = math.exp %74 : vector<2x128xf32>
    %cst_36 = arith.constant 1.000000e+00 : f32
    %76 = vector.broadcast %cst_36 : f32 to vector<2x128xf32>
    %77 = arith.addf %76, %75 : vector<2x128xf32>
    %78 = arith.divf %76, %77 : vector<2x128xf32>
    %79 = math.tanh %73 : vector<2x128xf32>
    %80 = arith.select %60, %79, %78 : vector<2x128xi1>, vector<2x128xf32>
    %81 = vector.extract_strided_slice %80 {offsets = [0, 0], sizes = [2, 32], strides = [1, 1]} : vector<2x128xf32> to vector<2x32xf32>
    %82 = vector.extract_strided_slice %80 {offsets = [0, 32], sizes = [2, 32], strides = [1, 1]} : vector<2x128xf32> to vector<2x32xf32>
    %83 = vector.extract_strided_slice %80 {offsets = [0, 64], sizes = [2, 32], strides = [1, 1]} : vector<2x128xf32> to vector<2x32xf32>
    %84 = vector.extract_strided_slice %80 {offsets = [0, 96], sizes = [2, 32], strides = [1, 1]} : vector<2x128xf32> to vector<2x32xf32>
    %85 = arith.mulf %82, %67 : vector<2x32xf32>
    %86 = arith.mulf %81, %83 : vector<2x32xf32>
    %87 = arith.addf %85, %86 : vector<2x32xf32>
    %88 = math.tanh %87 : vector<2x32xf32>
    %89 = arith.mulf %84, %88 : vector<2x32xf32>
    %c0_37 = arith.constant 0 : index
    %c32_38 = arith.constant 32 : index
    %90 = vector.load %arg2[%c0_37, %c32_38] : memref<2x64xf32, #tpu.memory_space<vmem>>, vector<2x32xf32>
    %c0_39 = arith.constant 0 : index
    %c32_40 = arith.constant 32 : index
    %91 = vector.load %arg3[%c0_39, %c32_40] : memref<2x64xf32, #tpu.memory_space<vmem>>, vector<2x32xf32>
    %cst_41 = arith.constant dense<0.000000e+00> : vector<2x128xf32>
    %92 = tpu.matmul %89, %63, %cst_41 {dimension_numbers = #tpu.dot_dimension_numbers<[1], [0], [0], [1], [0, 0, 1, 1], [], []>} : vector<2x32xf32>, vector<32x128xf32>, vector<2x128xf32> -> vector<2x128xf32>
    %cst_42 = arith.constant dense<0.000000e+00> : vector<2x128xf32>
    %93 = tpu.matmul %90, %65, %cst_42 {dimension_numbers = #tpu.dot_dimension_numbers<[1], [0], [0], [1], [0, 0, 1, 1], [], []>} : vector<2x32xf32>, vector<32x128xf32>, vector<2x128xf32> -> vector<2x128xf32>
    %94 = arith.addf %92, %93 : vector<2x128xf32>
    %95 = vector.extract_strided_slice %61 {offsets = [1, 0], sizes = [1, 128], strides = [1, 1]} : vector<2x128xf32> to vector<1x128xf32>
    %96 = vector.broadcast %95 : vector<1x128xf32> to vector<2x128xf32>
    %97 = arith.addf %94, %96 : vector<2x128xf32>
    %98 = arith.negf %97 : vector<2x128xf32>
    %99 = math.exp %98 : vector<2x128xf32>
    %cst_43 = arith.constant 1.000000e+00 : f32
    %100 = vector.broadcast %cst_43 : f32 to vector<2x128xf32>
    %101 = arith.addf %100, %99 : vector<2x128xf32>
    %102 = arith.divf %100, %101 : vector<2x128xf32>
    %103 = math.tanh %97 : vector<2x128xf32>
    %104 = arith.select %60, %103, %102 : vector<2x128xi1>, vector<2x128xf32>
    %105 = vector.extract_strided_slice %104 {offsets = [0, 0], sizes = [2, 32], strides = [1, 1]} : vector<2x128xf32> to vector<2x32xf32>
    %106 = vector.extract_strided_slice %104 {offsets = [0, 32], sizes = [2, 32], strides = [1, 1]} : vector<2x128xf32> to vector<2x32xf32>
    %107 = vector.extract_strided_slice %104 {offsets = [0, 64], sizes = [2, 32], strides = [1, 1]} : vector<2x128xf32> to vector<2x32xf32>
    %108 = vector.extract_strided_slice %104 {offsets = [0, 96], sizes = [2, 32], strides = [1, 1]} : vector<2x128xf32> to vector<2x32xf32>
    %109 = arith.mulf %106, %91 : vector<2x32xf32>
    %110 = arith.mulf %105, %107 : vector<2x32xf32>
    %111 = arith.addf %109, %110 : vector<2x32xf32>
    %112 = math.tanh %111 : vector<2x32xf32>
    %113 = arith.mulf %108, %112 : vector<2x32xf32>
    %c224 = arith.constant 224 : index
    %c0_44 = arith.constant 0 : index
    %114 = vector.load %arg1[%c224, %c0_44] : memref<264x128xf32, #tpu.memory_space<vmem>>, vector<32x32xf32>
    %cst_45 = arith.constant dense<0.000000e+00> : vector<2x32xf32>
    %115 = tpu.matmul %113, %114, %cst_45 {dimension_numbers = #tpu.dot_dimension_numbers<[1], [0], [0], [1], [0, 0, 1, 1], [], []>} : vector<2x32xf32>, vector<32x32xf32>, vector<2x32xf32> -> vector<2x32xf32>
    %c256 = arith.constant 256 : index
    %c0_46 = arith.constant 0 : index
    %116 = vector.load %arg1[%c256, %c0_46] : memref<264x128xf32, #tpu.memory_space<vmem>>, vector<1x32xf32>
    %117 = vector.broadcast %116 : vector<1x32xf32> to vector<2x32xf32>
    %118 = arith.addf %115, %117 : vector<2x32xf32>
    %cst_47 = arith.constant 0.000000e+00 : f32
    %119 = vector.broadcast %cst_47 : f32 to vector<2x88xf32>
    %120 = tpu.concatenate %118, %89, %113, %87, %111, %39, %119 in 1 : vector<2x32xf32>, vector<2x32xf32>, vector<2x32xf32>, vector<2x32xf32>, vector<2x32xf32>, vector<2x8xf32>, vector<2x88xf32> -> vector<2x256xf32>
    %c0_48 = arith.constant 0 : index
    %c0_49 = arith.constant 0 : index
    %121 = vector.load %arg5[%c0_48, %c0_49] : memref<2x256xf32, #tpu.memory_space<vmem>>, vector<2x256xf32>
    tpu.vector_store %arg5[%c0_48, %c0_49], %120 {strides = array<i32>} : memref<2x256xf32, #tpu.memory_space<vmem>>, vector<2x256xf32>,
    return
  }
}

</mosaic_0001>

<bundles_post_ra>
// kernel: decoder_attn_step.1
= control target key start
LH: loop header
LB: loop body
LE: loop exit
PB: predicated region body
PF: predicated region fallthrough
CT: control target
= control target key end

     0   :  { %10 = vsyncpa [#allocation4], 0  ;;  %s1506_s0 = inlined_call_operand.vmem [shape: s32[2], index: 0, kind: input, shape index: {}]   ;;  %s1507_s1 = inlined_call_operand.hbm [shape: f32[264,128], index: 1, kind: input, shape index: {}]   ;;  %s1508_s2 = inlined_call_operand.vmem [shape: f32[2,64], index: 2, kind: input, shape index: {}]   ;;  %s1509_s3 = inlined_call_operand.vmem [shape: f32[2,64], index: 3, kind: input, shape index: {}]   ;;  %s1510_s4 = inlined_call_operand.vmem [shape: f32[2,8,16], index: 4, kind: input, shape index: {}]   ;;  %s1511_s5 = inlined_call_operand.vmem [shape: f32[2,256], index: 5, kind: output, shape index: {}]  }
   0x1   :  { %s18_s20 = sshll.u32 %s1506_s0, 4  ;;  %s19_s20 = int_to_ptr.vmem [resolvable:$true] %s18_s20 }
   0x2   :  { %11 = vsyncpa [#allocation3], 0  ;;  %s1287_s21 = scalar_lea.vmem %s19_s20, 16  ;;  %p1292_p1 = scmp.lt.s32.totalorder %s19_s20, %s19_s20 }
   0x3   :  { %p1288_p0 = scmp.ne.s32.totalorder %s19_s20, %s1287_s21  ;;  %p1293_p2 = scmp.lt.s32.totalorder %s1287_s21, %s1287_s21 }
   0x5   :  { %p1294_p3 = por %p1293_p2, %p1292_p1 }
   0x7   :  { %p1295_p4 = pnand %p1294_p3, %p1288_p0 }
   0x9   :  { %1298 = shalt.err (!%p1295_p4)
}
   0xa   :  { %s1325_s22 = smov [#allocation2]   ;;  %s1326_s23 = smov [#allocation5]  }
   0xb   :  { %21 = dma.vmem_to_smem %s19_s20, 16, %s1325_s22, [#allocation4]  }
   0xc   :  { %s27_s24 = sshll.u32 %s1326_s23, 4  ;;  %s1299_s27 = scalar_lea.hbm %s1507_s1, 4224  ;;  %s28_s24 = int_to_ptr.vmem [resolvable:$true] %s27_s24 }
   0xd   :  { %p1300_p5 = scmp.ne.s32.totalorder %s1507_s1, %s1299_s27  ;;  %p1303_p6 = scmp.lt.u32.totalorder %s1299_s27, %s1507_s1 }
   0xf   :  { %p1305_p7 = pnand %p1303_p6, %p1300_p5 }
  0x11   :  { %1308 = shalt.err (!%p1305_p7)
}
  0x12   :  { %s1309_s6 = scalar_lea.vmem %s28_s24, 4224  ;;  %p1314_p9 = scmp.lt.s32.totalorder %s28_s24, %s28_s24 }
  0x13   :  { %p1310_p8 = scmp.ne.s32.totalorder %s28_s24, %s1309_s6  ;;  %p1315_p10 = scmp.lt.s32.totalorder %s1309_s6, %s1309_s6 }
  0x15   :  { %p1316_p11 = por %p1315_p10, %p1314_p9 }
  0x17   :  { %p1317_p12 = pnand %p1316_p11, %p1310_p8 }
  0x19   :  { %1320 = shalt.err (!%p1317_p12)
}
  0x1a   :  { %s1327_s7 = smov 128   ;;  %s1328_s8 = smov 8  }
  0x1b   :  { %33 = dma.hbm_to_vmem [thread:$0]  %s1507_s1, 4224, %s28_s24, [#allocation3], %s1327_s7, %s1327_s7, %s1328_s8  }
  0x1c   :  { %1321 = dma.done.wait [#allocation4], 16  }
  0x1d   :  { %1322 = vsyncadd [#allocation4], 4294967280 }
  0x1e   :  { %1323 = dma.done.wait [#allocation3], 4224  }
  0x1f   :  { %1324 = vsyncadd [#allocation3], 4294963072 }
  0x20   :  { %46 = sfence }
  0x21   :  { %v63_v0 = vld [vmem:[#allocation5] sm:$0xff]  ;;  %v64_v1 = vld [vmem:[#allocation5 + $0x8] sm:$0xff]  ;;  %v65_v2 = vld [vmem:[#allocation5 + $0x10] sm:$0xff]  ;;  %v47_v3 = vlaneseq  ;;  %v1329_v4 = vmov 0.0|0.0   ;;  %vm1330_vm0 = vmmov 0   ;;  %v1331_v7 = vmov 0.0  }
  0x22   :  { %1211 = vmatprep.subr.bf16.mxu0 %v1329_v4  ;;  %v1212_v5 = vpack.c.bf16 %v64_v1, %v63_v0  ;;  %v66_v6 = vld [vmem:[#allocation5 + $0x18] sm:$0xff]  ;;  %1122 = vmatprep.mubr.msk.f32.mxu0 %vm1330_vm0, %v1331_v7  ;;  %s51_s1 = sld [smem:[#allocation2]]  ;;  %s1053_s11 = sld [smem:[#allocation2 + $0x1]]  ;;  %v141_v9 = vld [vmem:[#allocation5 + $0x20] sm:$0xff]  ;;  %v142_v10 = vld [vmem:[#allocation5 + $0x28] sm:$0xff]  ;;  %vm67_vm6 = vcmask 261120  }
  0x23   :  { %v1385_v8 = vshrl.u32 %v47_v3, 7  ;;  %1217 = vmatprep.subr.bf16.mxu1 %v1329_v4  ;;  %1129 = vmatprep.mubr.msk.f32.mxu1 %vm1330_vm0, %v1331_v7  ;;  %v1215_v11 = vpack.c.bf16 %v66_v6, %v65_v2  ;;  %v1218_v12 = vpack.c.bf16 %v142_v10, %v141_v9  ;;  %v1391_v13 = vand.u32 127, %v47_v3  ;;  %v223_v18 = vld [vmem:[#allocation5 + $0x38] sm:$0xff]  ;;  %v224_v19 = vld [vmem:[#allocation5 + $0x40] sm:$0xff]  ;;  %v225_v21 = vld [vmem:[#allocation5 + $0x48] sm:$0xff]  ;;  %s1333_s19 = smov 32  }
  0x24   :  { %1213 = vmatpush3.bf16.msra.mxu0 %v1212_v5  ;;  %vm148_vm8 = vcmask 130048   ;;  %v1221_v20 = vpack.c.bf16 %v224_v19, %v223_v18  ;;  %v226_v22 = vld [vmem:[#allocation5 + $0x50] sm:$0xff]  ;;  %v1410_v26 = vld [vmem:[%s1508_s2] sm:$0x3]  ;;  %vm301_vm9 = vcmask 58368   ;;  %vm314_vm10 = vcmask 64512  }
  0x25   :  { %1214 = vmatprep.subr.bf16.mxu0 %v1329_v4  ;;  %1219 = vmatpush3.bf16.msra.mxu1 %v1218_v12  ;;  %vm52_vm1 = vcmp.eq.s32.totalorder %v1385_v8, 0  ;;  %vm58_vm2 = vcmp.eq.s32.totalorder %v1385_v8, 1  ;;  %v1224_v25 = vpack.c.bf16 %v226_v22, %v225_v21  ;;  %v1055_v29 = vld [vmem:[#allocation5 + $0x30] ss:$0 sm:$0xff]  ;;  %v313_v40 = vld [vmem:[%s1510_s4] sm:$0xff]  ;;  %v1059_v44 = vld [vmem:[%s1510_s4 + $0x8] sm:$0xff] }
  0x26   :  { %1220 = vmatprep.subr.bf16.mxu1 %v1329_v4  ;;  %v468_v46 = vld [vmem:[#allocation5 + $0x58] sm:$0xff]  ;;  %v469_v47 = vld [vmem:[#allocation5 + $0x60] sm:$0xff]  ;;  %vm466_vm11 = vcmask 1040384   ;;  %v561_v57 = vld [vmem:[#allocation5 + $0x88] sm:$0xff]  ;;  %s1332_s4 = smov 120   ;;  %v715_v12 = vsub.s32 0, %v1385_v8 }
  0x27   :  { %v1227_v48 = vpack.c.bf16 %v469_v47, %v468_v46  ;;  %v559_v55 = vld [vmem:[#allocation5 + $0x78] sm:$0xff]  ;;  %v560_v56 = vld [vmem:[#allocation5 + $0x80] sm:$0xff]  ;;  %v562_v59 = vld [vmem:[#allocation5 + $0x90] sm:$0xff]  ;;  %vm549_vm12 = vcmp.ge.s32.totalorder %v1391_v13, 64  ;;  %vm550_vm13 = vcmp.lt.s32.totalorder %v1391_v13, 96  ;;  %s1335_s20 = smov 96  }
  0x28   :  { %1216 = vmatpush3.bf16.msra.mxu0 %v1215_v11  ;;  %v53_v14 = vstv %s51_s1  ;;  %v59_v15 = vstv %s1053_s11  ;;  %v1230_v58 = vpack.c.bf16 %v560_v56, %v559_v55  ;;  %v553_v60 = vld [vmem:[#allocation5 + $0x68] sm:$0xff]  ;;  %v554_v61 = vld [vmem:[#allocation5 + $0x70] sm:$0xff]  ;;  %v1233_v63 = vpack.c.bf16 %v562_v59, %v561_v57  ;;  %v1452_v6 = vld [vmem:[%s1509_s3] sm:$0x3]  ;;  %s1334_s3 = smov 64  }
  0x29   :  { %vm54_vm3 = vcmp.eq.s32.totalorder %v1391_v13, %v53_v14  ;;  %vm60_vm4 = vcmp.eq.s32.totalorder %v1391_v13, %v59_v15  ;;  %1143 = vmatprep.subr.mxu0 %v1331_v7  ;;  %v1236_v62 = vpack.c.bf16 %v554_v61, %v553_v60  ;;  %v552_v14 = vld [vmem:[#allocation5 + $0xd8] sm:$0x3]  ;;  %vm1462_vm14 = vmand %vm549_vm12, %vm550_vm13  ;;  %vm1028_vm15 = vcmask 523264  }
  0x2a   :  { %vm55_vm5 = vmand %vm52_vm1, %vm54_vm3  ;;  %v716_v15 = vrot.slane %v552_v14, %v715_v12  ;;  %v929_v12 = vld [vmem:[#allocation5 + $0xf8] sm:$0xff]  ;;  %vm1030_vm1 = vcmask 785408  }
  0x2b   :  { %v56_v16 = vsel %vm55_vm5, 1.0, %v1331_v7  ;;  %vm61_vm7 = vmand %vm58_vm2, %vm60_vm4 }
  0x2c   :  { %v62_v17 = vsel %vm61_vm7, 1.0, %v56_v16 }
  0x2d   :  { %1123 = vmatmul.mubr.msk.f32.vlgmr.msra.gmra.mrb[0].mxu0 %vm67_vm6, %v62_v17 }
  0x2e   :  { %1145 = vmatprep.mubr.msk.f32.mxu0 %vm1330_vm0, %v1331_v7  ;;  %1144 = vmatpush3.msra.mxu0 %v313_v40 }
  0x2f   :  { %1148 = vmatprep.subr.mxu0 %v1331_v7 }
 0x100   :  { %v137_v23 = vpop.f32.mrb[0].mxu0 }
 0x101   :  { %v1124_v24 = vpop.f32.mrb[1].mxu0  ;;  %1130 = vmatmul.mubr.msk.f32.vlgmr.msra.gmra.mrb[0].mxu1 %vm148_vm8, %v137_v23 }
 0x102   :  { %1222 = vmatpush3.bf16.msra.mxu1 %v1221_v20  ;;  %1140 = vmatprep.mubr.msk.f32.mxu1 %vm1330_vm0, %v1331_v7 }
 0x103   :  { %1223 = vmatprep.subr.bf16.mxu1 %v1329_v4 }
 0x106   :  { %1225 = vmatpush3.bf16.msra.mxu1 %v1224_v25 }
 0x107   :  { %1226 = vmatprep.subr.bf16.mxu1 %v1329_v4 }
 0x109   :  { %1141 = vmatmul.mubr.msk.f32.vlgmr.msra.gmra.mrb[2].mxu1 %vm67_vm6, %v1410_v26 }
 0x10a   :  { %1157 = vmatprep.mubr.msk.f32.mxu1 %vm1330_vm0, %v1331_v7  ;;  %1228 = vmatpush3.bf16.msra.mxu1 %v1227_v48 }
 0x10b   :  { %1235 = vmatprep.subr.bf16.mxu1 %v1329_v4 }
 0x1d4   :  { %v218_v27 = vpop.f32.mrb[0].mxu1 }
 0x1d5   :  { %v1131_v28 = vpop.f32.mrb[1].mxu1  ;;  %v1417_v30 = vadd.f32 %v1055_v29, %v218_v27 }
 0x1dc   :  { %v296_v31 = vpop.f32.mrb[2].mxu1 }
 0x1dd   :  { %v300_v32 = vadd.f32 %v296_v31, %v1417_v30  ;;  %v1142_v33 = vpop.f32.mrb[3].mxu1 }
 0x1de   :  { %v563_v33 = vld [vmem:[#allocation5 + $0xb8] sm:$0xff] }
 0x1df   :  { %v302_v34 = vsel %vm301_vm9, %v300_v32, -inf }
 0x1e0   :  { %303 = vmax.xlane.f32.xlu0 %v302_v34  ;;  %v564_v34 = vld [vmem:[#allocation5 + $0xc0] sm:$0xff] }
 0x26d   :  { %v304_v35 = vpop.xlane.xlu0 %303 }
 0x26e   :  { %v305_v36 = vsub.f32 %v300_v32, %v304_v35  ;;  %v565_v35 = vld [vmem:[#allocation5 + $0xc8] sm:$0xff] }
 0x270   :  { %v306_v37 = vmul.f32 1.442695, %v305_v36  ;;  %v1239_v36 = vpack.c.bf16 %v564_v34, %v563_v33 }
 0x272   :  { %1267 = vpow2.f32 %v306_v37  ;;  %v566_v37 = vld [vmem:[#allocation5 + $0xd0] sm:$0xff] }
 0x27c   :  { %v1268_v38 = vpop.eup %1267 }
 0x27d   :  { %v308_v39 = vsel %vm301_vm9, %v1268_v38, 0.0 }
 0x27e   :  { %309 = vadd.xlane.f32.xlu0 %v308_v39  ;;  %v556_v39 = vld [vmem:[#allocation5 + $0xa0] sm:$0xff] }
 0x30b   :  { %v310_v41 = vpop.xlane.xlu0 %309 }
 0x30c   :  { %1269 = vrcp.f32 %v310_v41  ;;  %v557_v41 = vld [vmem:[#allocation5 + $0xa8] sm:$0xff] }
 0x316   :  { %v1270_v42 = vpop.eup %1269 }
 0x317   :  { %v1424_v43 = vmul.f32 %v1270_v42, %v1268_v38  ;;  %v555_v38 = vld [vmem:[#allocation5 + $0x98] sm:$0xff]  ;;  %v558_v42 = vld [vmem:[#allocation5 + $0xb0] sm:$0xff] }
 0x318   :  { %v1245_v40 = vpack.c.bf16 %v556_v39, %v555_v38 }
 0x319   :  { %1146 = vmatmul.mubr.msk.f32.vlgmr.msra.gmra.mrb[2].mxu0 %vm314_vm10, %v1424_v43  ;;  %v390_v45 = vrot.slane %v1424_v43, 1 }
 0x31a   :  { %1149 = vmatpush3.msra.mxu0 %v1059_v44  ;;  %1150 = vmatprep.mubr.msk.f32.mxu0 %vm1330_vm0, %v1331_v7  ;;  %v1242_v44 = vpack.c.bf16 %v566_v37, %v565_v35 }
 0x31b   :  { %1229 = vmatprep.subr.bf16.mxu0 %v1329_v4 }
 0x31d   :  { %1151 = vmatmul.mubr.msk.f32.vlgmr.msra.gmra.mrb[4].mxu0 %vm314_vm10, %v390_v45  ;;  %v1248_v45 = vpack.c.bf16 %v558_v42, %v557_v41 }
 0x31e   :  { %1168 = vmatprep.mubr.msk.f32.mxu0 %vm1330_vm0, %v1331_v7  ;;  %1231 = vmatpush3.bf16.msra.mxu0 %v1230_v58 }
 0x31f   :  { %1232 = vmatprep.subr.bf16.mxu0 %v1329_v4 }
 0x322   :  { %1234 = vmatpush3.bf16.msra.mxu0 %v1233_v63 }
 0x323   :  { %1244 = vmatprep.subr.bf16.mxu0 %v1329_v4 }
 0x325   :  { %1169 = vmatmul.mubr.msk.f32.vlgmr.msra.gmra.mrb[6].mxu0 %vm67_vm6, %v1410_v26 }
 0x326   :  { %1197 = vmatprep.mubr.msk.f32.mxu0 %vm1330_vm0, %v1331_v7  ;;  %1246 = vmatpush3.bf16.msra.mxu0 %v1245_v40 }
 0x327   :  { %1247 = vmatprep.subr.bf16.mxu0 %v1329_v4 }
 0x32a   :  { %1249 = vmatpush3.bf16.msra.mxu0 %v1248_v45 }
 0x3ec   :  { %v384_v49 = vpop.f32.mrb[2].mxu0 }
 0x3ed   :  { %v1147_v50 = vpop.f32.mrb[3].mxu0 }
 0x3f0   :  { %v459_v51 = vpop.f32.mrb[4].mxu0 }
 0x3f1   :  { %v464_v52 = vrot.slane %v459_v51, 7  ;;  %v1152_v53 = vpop.f32.mrb[5].mxu0 }
 0x3f2   :  { %v898_v53 = vsub.s32 1, %v1385_v8 }
 0x3f3   :  { %v467_v54 = vsel %vm466_vm11, %v384_v49, %v464_v52 }
 0x3f4   :  { %1158 = vmatmul.mubr.msk.f32.vlgmr.msra.gmra.mrb[4].mxu1 %vm148_vm8, %v467_v54  ;;  %v899_v54 = vrot.slane %v552_v14, %v898_v53 }
 0x3f5   :  { %1175 = vmatprep.mubr.msk.f32.mxu1 %vm1330_vm0, %v1331_v7  ;;  %1237 = vmatpush3.bf16.msra.mxu1 %v1236_v62 }
 0x3f6   :  { %1238 = vmatprep.subr.bf16.mxu1 %v1329_v4 }
 0x3f8   :  { %v634_v9 = vpop.f32.mrb[6].mxu0 }
 0x3f9   :  { %v1170_v10 = vpop.f32.mrb[7].mxu0 }
 0x4c7   :  { %v539_v0 = vpop.f32.mrb[4].mxu1 }
 0x4c8   :  { %544 = vrot.lane.b32.xlu1 %v539_v0, %s1328_s8  ;;  %v1159_v1 = vpop.f32.mrb[5].mxu1 }
 0x53a   :  { %v545_v2 = vpop.permute.xlu1 %544 }
 0x53b   :  { %v547_v3 = vadd.f32 %v545_v2, %v1417_v30 }
 0x53d   :  { %v548_v5 = vmax.f32 %v547_v3, 0.0  ;;  %v926_v3 = vld [vmem:[#allocation5 + $0xe0] sm:$0xff] }
 0x53f   :  { %639 = vrot.lane.b32.xlu1 %v548_v5, %s1332_s4  ;;  %v927_v5 = vld [vmem:[#allocation5 + $0xe8] sm:$0xff] }
 0x543   :  { %727 = vrot.lane.b32.xlu1 %v1452_v6, %s1333_s19 }
 0x5b1   :  { %v640_v11 = vpop.permute.xlu1 %639 }
 0x5b2   :  { %1176 = vmatmul.mubr.msk.f32.vlgmr.msra.gmra.mrb[6].mxu1 %vm148_vm8, %v640_v11  ;;  %v1251_v11 = vpack.c.bf16 %v927_v5, %v926_v3 }
 0x5b3   :  { %1186 = vmatprep.mubr.msk.f32.mxu1 %vm1330_vm0, %v1331_v7  ;;  %1240 = vmatpush3.bf16.msra.mxu1 %v1239_v36 }
 0x5b4   :  { %1241 = vmatprep.subr.bf16.mxu1 %v1329_v4 }
 0x5b5   :  { %v728_v30 = vpop.permute.xlu1 %727 }
 0x5b7   :  { %1243 = vmatpush3.bf16.msra.mxu1 %v1242_v44 }
 0x5b8   :  { %1250 = vmatprep.subr.bf16.mxu1 %v1329_v4 }
 0x685   :  { %v709_v16 = vpop.f32.mrb[6].mxu1 }
 0x686   :  { %v710_v17 = vadd.f32 %v709_v16, %v634_v9  ;;  %v1177_v18 = vpop.f32.mrb[7].mxu1  ;;  %v928_v9 = vld [vmem:[#allocation5 + $0xf0] sm:$0xff] }
 0x687   :  { %v1254_v14 = vpack.c.bf16 %v929_v12, %v928_v9 }
 0x688   :  { %v717_v19 = vadd.f32 %v716_v15, %v710_v17 }
 0x68a   :  { %v1064_v20 = vmul.f32 -1.442695, %v717_v19 }
 0x68c   :  { %1271 = vpow2.f32 %v1064_v20 }
 0x68d   :  { %1273 = vtanh.f32 %v717_v19  ;;  %v1068_v19 = vld [vmem:[#allocation5 + $0x100] ss:$0 sm:$0xff] }
 0x696   :  { %v1272_v21 = vpop.eup %1271 }
 0x697   :  { %v721_v22 = vadd.f32 1.0, %v1272_v21  ;;  %v1274_v24 = vpop.eup %1273 }
 0x699   :  { %1275 = vrcp.f32 %v721_v22 }
 0x6a3   :  { %v1276_v25 = vpop.eup %1275 }
 0x6a4   :  { %v725_v27 = vsel %vm1462_vm14, %v1274_v24, %v1276_v25 }
 0x6a5   :  { %732 = vrot.lane.b32.xlu0 %v725_v27, %s1334_s3  ;;  %v730_v31 = vmul.f32 %v728_v30, %v725_v27 }
 0x717   :  { %v733_v28 = vpop.permute.xlu0 %732 }
 0x718   :  { %v735_v29 = vmul.f32 %v733_v28, %v725_v27 }
 0x71a   :  { %737 = vrot.lane.b32.xlu1 %v735_v29, %s1333_s19 }
 0x78c   :  { %v738_v32 = vpop.permute.xlu1 %737 }
 0x78d   :  { %v1470_v13 = vadd.f32 %v738_v32, %v730_v31 }
 0x78f   :  { %1277 = vtanh.f32 %v1470_v13 }
 0x799   :  { %v1278_v46 = vpop.eup %1277 }
 0x79a   :  { %743 = vrot.lane.b32.xlu1 %v1278_v46, %s1334_s3 }
 0x79e   :  { %747 = vrot.lane.b32.xlu1 %v1410_v26, %s1335_s20 }
 0x80c   :  { %v744_v47 = vpop.permute.xlu1 %743 }
 0x80d   :  { %v746_v48 = vmul.f32 %v744_v47, %v725_v27 }
 0x80f   :  { %822 = vrot.lane.b32.xlu1 %v746_v48, %s1333_s19 }
 0x810   :  { %v748_v49 = vpop.permute.xlu1 %747 }
 0x811   :  { %1187 = vmatmul.mubr.msk.f32.vlgmr.msra.gmra.mrb[8].mxu1 %vm67_vm6, %v748_v49 }
 0x812   :  { %1208 = vmatprep.mubr.msk.f32.mxu1 %vm1330_vm0, %v1331_v7  ;;  %1252 = vmatpush3.bf16.msra.mxu1 %v1251_v11  ;;  %vm1033_vm0 = vcmask 326656  }
 0x813   :  { %1253 = vmatprep.subr.bf16.mxu1 %v1329_v4 }
 0x816   :  { %1255 = vmatpush3.bf16.msra.mxu1 %v1254_v14 }
 0x881   :  { %v823_v50 = vpop.permute.xlu1 %822 }
 0x882   :  { %1198 = vmatmul.mubr.msk.f32.vlgmr.msra.gmra.mrb[8].mxu0 %vm67_vm6, %v823_v50 }
 0x8e4   :  { %v817_v51 = vpop.f32.mrb[8].mxu1 }
 0x8e5   :  { %v1188_v52 = vpop.f32.mrb[9].mxu1 }
 0x955   :  { %v892_v55 = vpop.f32.mrb[8].mxu0 }
 0x956   :  { %v893_v26 = vadd.f32 %v892_v55, %v817_v51  ;;  %v1199_v56 = vpop.f32.mrb[9].mxu0 }
 0x958   :  { %v900_v57 = vadd.f32 %v899_v54, %v893_v26 }
 0x95a   :  { %v1067_v58 = vmul.f32 -1.442695, %v900_v57 }
 0x95c   :  { %1279 = vpow2.f32 %v1067_v58 }
 0x95d   :  { %1281 = vtanh.f32 %v900_v57 }
 0x966   :  { %v1280_v59 = vpop.eup %1279 }
 0x967   :  { %v904_v60 = vadd.f32 1.0, %v1280_v59  ;;  %v1282_v61 = vpop.eup %1281 }
 0x969   :  { %1283 = vrcp.f32 %v904_v60 }
 0x973   :  { %v1284_v7 = vpop.eup %1283 }
 0x974   :  { %v908_v62 = vsel %vm1462_vm14, %v1282_v61, %v1284_v7 }
 0x975   :  { %911 = vrot.lane.b32.xlu1 %v908_v62, %s1334_s3  ;;  %v909_v0 = vmul.f32 %v908_v62, %v1452_v6 }
 0x9e7   :  { %v912_v63 = vpop.permute.xlu1 %911 }
 0x9e8   :  { %v914_v8 = vmul.f32 %v912_v63, %v908_v62 }
 0x9ea   :  { %916 = vrot.lane.b32.xlu0 %v914_v8, %s1333_s19 }
 0xa5c   :  { %v917_v1 = vpop.permute.xlu0 %916 }
 0xa5d   :  { %v919_v2 = vadd.f32 %v917_v1, %v909_v0 }
 0xa5f   :  { %1285 = vtanh.f32 %v919_v2 }
 0xa69   :  { %v1286_v10 = vpop.eup %1285 }
 0xa6a   :  { %922 = vrot.lane.b32.xlu1 %v1286_v10, %s1334_s3 }
 0xa6e   :  { %1010 = vrot.lane.b32.xlu1 %v746_v48, %s1334_s3 }
 0xa72   :  { %1021 = vrot.lane.b32.xlu1 %v919_v2, %s1335_s20 }
 0xa76   :  { %1017 = vrot.lane.b32.xlu1 %v1470_v13, %s1334_s3 }
 0xadc   :  { %v923_v6 = vpop.permute.xlu1 %922 }
 0xadd   :  { %v925_v15 = vmul.f32 %v923_v6, %v908_v62 }
 0xadf   :  { %936 = vrot.lane.b32.xlu0 %v925_v15, %s1333_s19 }
 0xae0   :  { %v1011_v4 = vpop.permute.xlu1 %1010 }
 0xae3   :  { %1013 = vrot.lane.b32.xlu0 %v925_v15, %s1335_s20 }
 0xae4   :  { %v1022_v18 = vpop.permute.xlu1 %1021 }
 0xae7   :  { %1024 = vrot.lane.b32.xlu0 %v1424_v43, %s1333_s19 }
 0xae8   :  { %v1018_v27 = vpop.permute.xlu1 %1017 }
 0xb51   :  { %v937_v16 = vpop.permute.xlu0 %936 }
 0xb52   :  { %1209 = vmatmul.mubr.msk.f32.vlgmr.msra.gmra.mrb[10].mxu1 %vm67_vm6, %v937_v16 }
 0xb55   :  { %v1014_v17 = vpop.permute.xlu0 %1013 }
 0xb59   :  { %v1025_v20 = vpop.permute.xlu0 %1024 }
 0xb5a   :  { %v1032_v24 = vsel %vm67_vm6, %v1022_v18, %v1025_v20 }
 0xb5b   :  { %v1034_v28 = vsel %vm1033_vm0, %v1032_v24, 0.0 }
 0xc25   :  { %v1006_v21 = vpop.f32.mrb[10].mxu1 }
 0xc26   :  { %v1007_v22 = vadd.f32 %v1068_v19, %v1006_v21  ;;  %v1210_v23 = vpop.f32.mrb[11].mxu1 }
 0xc28   :  { %v1027_v25 = vsel %vm67_vm6, %v1007_v22, %v1011_v4 }
 0xc29   :  { %v1029_v43 = vsel %vm1028_vm15, %v1027_v25, %v1014_v17 }
 0xc2a   :  { %v1031_v29 = vsel %vm1030_vm1, %v1029_v43, %v1018_v27 }
 0xc2b   :  { %v1037_v30 = vcombine.low %v1031_v29, %v1034_v28 }
 0xc2d   :  { %1070 = vst.sshfl [vmem:[%s1511_s5] sm:$0x33 pattern:$0x76325410] %v1037_v30 }
 0xc2e   :  { %1051 = vsyncpa [#allocation3], 1 }
 0xc2f   :  { %1052 = vsyncpa [#allocation4], 1 }

</bundles_post_ra>
